<compile_context>
chip_gen: v7x
topology: tpu7x:2x2x1
jax: 0.10.0
libtpu: 0.0.40
codegen_flags: <defaults>
</compile_context>

<pallas_src>
import functools

import jax
import jax.numpy as jnp
from jax.experimental import pallas as pl
from jax.experimental.pallas import tpu as pltpu


# ----------------------------------------------------------------------------
# Small integer helpers
# ----------------------------------------------------------------------------
def _cdiv(a: int, b: int) -> int:
    return -(-a // b)


def _round_up(x: int, m: int) -> int:
    return _cdiv(x, m) * m


def _select_tile(extent: int, max_tile: int, align: int):
    """Pick (tile, padded_extent).

    tile is a multiple of `align`, at most round_up(max_tile, align), chosen
    so the number of tiles is minimal and the padding beyond alignment is
    < one tile's worth of `align` slack (never a whole extra tile).
    """
    extent = _round_up(max(extent, 1), align)
    cap = max(align, _round_up(max_tile, align))
    ntiles = _cdiv(extent, cap)
    tile = _round_up(_cdiv(extent, ntiles), align)
    return tile, ntiles * tile


def _pad_cast_2d(a, rows: int, cols: int, dtype):
    """Cast + zero-pad a 2-D array; no-op (no copies) if already aligned."""
    if a.dtype != dtype:
        a = a.astype(dtype)
    pr, pc = rows - a.shape[0], cols - a.shape[1]
    if pr or pc:
        a = jnp.pad(a, ((0, pr), (0, pc)))
    return a


# ----------------------------------------------------------------------------
# Kernel: z = x @ w + b ; out = softplus(z)   (accumulate in the f32 output)
# ----------------------------------------------------------------------------
def _linear_softplus_kernel(x_ref, w_ref, b_ref, o_ref):
    k = pl.program_id(2)

    @pl.when(k == 0)
    def _init():
        o_ref[...] = jnp.zeros_like(o_ref)

    # MXU matmul on this (TM, TK) x (TK, TN) tile, accumulated directly in
    # the f32 output block (resident across the K axis).
    o_ref[...] += jnp.dot(
        x_ref[...], w_ref[...], preferred_element_type=jnp.float32
    )

    @pl.when(k == pl.num_programs(2) - 1)
    def _finalize():
        z = o_ref[...] + b_ref[...]  # (1, TN) bias broadcasts over rows (f32)
        # PyTorch Softplus (beta=1, threshold=20): z if z > 20 else log1p(exp(z))
        sp = jnp.log1p(jnp.exp(jnp.minimum(z, 20.0)))
        o_ref[...] = jnp.where(z > 20.0, z, sp)


def _pallas_linear_softplus(xp, wp, bp, tm: int, tn: int, tk: int):
    """pallas_call on already padded/aligned operands."""
    m_pad, k_pad = xp.shape
    n_pad = wp.shape[1]
    grid = (m_pad // tm, n_pad // tn, k_pad // tk)

    itemsize = jnp.dtype(xp.dtype).itemsize
    # Double-buffered VMEM footprint (x, w, bias inputs + f32 output).
    footprint = 2 * (tm * tk * itemsize + tk * tn * itemsize
                     + tn * 4 + tm * tn * 4)
    # v5e scoped default is only 16 MiB; be explicit.  v7x physical is 64 MiB.
    vmem_limit = min(int(footprint) + (4 << 20), 64 << 20)

    return pl.pallas_call(
        _linear_softplus_kernel,
        out_shape=jax.ShapeDtypeStruct((m_pad, n_pad), jnp.float32),
        grid=grid,
        in_specs=[
            pl.BlockSpec((tm, tk), lambda i, j, k: (i, k)),   # x tile
            pl.BlockSpec((tk, tn), lambda i, j, k: (k, j)),   # w tile
            pl.BlockSpec((1, tn), lambda i, j, k: (0, j)),    # bias (resident)
        ],
        out_specs=pl.BlockSpec((tm, tn), lambda i, j, k: (i, j)),
        compiler_params=pltpu.CompilerParams(
            dimension_semantics=("parallel", "parallel", "arbitrary"),
            vmem_limit_bytes=vmem_limit,
        ),
    )(xp, wp, bp)


def _m_align(compute_dtype) -> int:
    # f32 -> 8 sublanes, bf16 -> 16 (min bf16 tile is (16, 128)).
    return 8 * (4 // jnp.dtype(compute_dtype).itemsize)


# ----------------------------------------------------------------------------
# Functional forward (pads x / w / b per call, with aligned fast path)
# ----------------------------------------------------------------------------
@functools.partial(
    jax.jit, static_argnames=("tm_max", "tn_max", "tk_max", "compute_dtype")
)
def my_model_forward(x, w, b, *, tm_max=512, tn_max=512, tk_max=2048,
                     compute_dtype=jnp.bfloat16):
    """x: (N, D_in), w: (D_in, D_out), b: (D_out,) -> softplus(x @ w + b), f32."""
    N, D_in = x.shape
    D_out = w.shape[1]

    tm, m_pad = _select_tile(N, tm_max, _m_align(compute_dtype))
    tn, n_pad = _select_tile(D_out, tn_max, 128)
    tk, k_pad = _select_tile(D_in, tk_max, 128)

    xp = _pad_cast_2d(x, m_pad, k_pad, compute_dtype)
    wp = _pad_cast_2d(w, k_pad, n_pad, compute_dtype)
    bp = _pad_cast_2d(b.reshape(1, -1), 1, n_pad, jnp.float32)

    out = _pallas_linear_softplus(xp, wp, bp, tm, tn, tk)
    return out[:N, :D_out]


# ----------------------------------------------------------------------------
# Module-style wrapper: weights padded/cast ONCE at construction time
# ----------------------------------------------------------------------------
@functools.partial(
    jax.jit, static_argnames=("tm_max", "tn", "tk", "d_out", "compute_dtype")
)
def _forward_prepadded(x, wp, bp, *, tm_max, tn, tk, d_out, compute_dtype):
    N = x.shape[0]
    k_pad = wp.shape[0]
    tm, m_pad = _select_tile(N, tm_max, _m_align(compute_dtype))
    xp = _pad_cast_2d(x, m_pad, k_pad, compute_dtype)
    out = _pallas_linear_softplus(xp, wp, bp, tm, tn, tk)
    return out[:N, :d_out]


class MyModelPallas:
    """Softplus(Linear(x)) with pre-padded / pre-cast weights (no per-call
    HBM copies of W or b)."""

    def __init__(self, w, b, *, tn_max=512, tk_max=2048,
                 compute_dtype=jnp.bfloat16):
        w = jnp.asarray(w)
        b = jnp.asarray(b)
        D_in, D_out = w.shape
        self.d_out = D_out
        self.compute_dtype = compute_dtype
        self.tn, n_pad = _select_tile(D_out, tn_max, 128)
        self.tk, k_pad = _select_tile(D_in, tk_max, 128)
        # Pad + cast once, outside the per-call path.
        self.wp = _pad_cast_2d(w, k_pad, n_pad, compute_dtype)
        self.bp = _pad_cast_2d(b.reshape(1, -1), 1, n_pad, jnp.float32)

    def __call__(self, x, *, tm_max=512):
        return _forward_prepadded(
            x, self.wp, self.bp, tm_max=tm_max, tn=self.tn, tk=self.tk,
            d_out=self.d_out, compute_dtype=self.compute_dtype)


# ----------------------------------------------------------------------------
# Reference (matches torch.nn.Softplus(torch.nn.Linear(D_in, D_out)(x)))
# ----------------------------------------------------------------------------
def _reference(x, w, b):
    z = x.astype(jnp.float32) @ w.astype(jnp.float32) + b.astype(jnp.float32)
    return jnp.where(z > 20.0, z, jnp.log1p(jnp.exp(jnp.minimum(z, 20.0))))


if __name__ == "__main__":
    key = jax.random.PRNGKey(0)

    # --- Case 1: the module's demo shapes (batch=8, D_in=32, D_out=16) -----
    N, D_in, D_out = 8, 32, 16
    kx, kw, kb, key = jax.random.split(key, 4)
    x = jax.random.normal(kx, (N, D_in), dtype=jnp.float32)
    bound = 1.0 / jnp.sqrt(jnp.float32(D_in))
    w = jax.random.uniform(kw, (D_in, D_out), jnp.float32, -bound, bound)
    b = jax.random.uniform(kb, (D_out,), jnp.float32, -bound, bound)
    ref = _reference(x, w, b)

    out_f32 = my_model_forward(x, w, b, compute_dtype=jnp.float32)
    jax.block_until_ready(out_f32)
    assert out_f32.shape == (N, D_out)
    assert jnp.allclose(out_f32, ref, atol=1e-5, rtol=1e-5), "f32 small mismatch"

    out_bf16 = my_model_forward(x, w, b)  # default bf16 MXU feed
    jax.block_until_ready(out_bf16)
    assert jnp.allclose(out_bf16, ref, atol=5e-2, rtol=5e-2), "bf16 small mismatch"

    # --- Case 2: ragged multi-tile case (exercises adaptive M tiling) ------
    N2, D_in2, D_out2 = 520, 1000, 200
    kx, kw, kb, key = jax.random.split(key, 4)
    x2 = jax.random.normal(kx, (N2, D_in2), dtype=jnp.float32)
    bound2 = 1.0 / jnp.sqrt(jnp.float32(D_in2))
    w2 = jax.random.uniform(kw, (D_in2, D_out2), jnp.float32, -bound2, bound2)
    b2 = jax.random.uniform(kb, (D_out2,), jnp.float32, -bound2, bound2)
    ref2 = _reference(x2, w2, b2)

    out2_f32 = my_model_forward(x2, w2, b2, compute_dtype=jnp.float32)
    jax.block_until_ready(out2_f32)
    assert out2_f32.shape == (N2, D_out2)
    assert jnp.allclose(out2_f32, ref2, atol=1e-4, rtol=1e-4), "f32 tiled mismatch"

    out2_bf16 = my_model_forward(x2, w2, b2)  # default bf16 MXU feed
    jax.block_until_ready(out2_bf16)
    assert jnp.allclose(out2_bf16, ref2, atol=5e-2, rtol=5e-2), "bf16 tiled mismatch"

    # --- Case 3: module-style wrapper with pre-padded weights --------------
    model = MyModelPallas(w2, b2)
    out3 = model(x2)
    jax.block_until_ready(out3)
    assert out3.shape == (N2, D_out2)
    assert jnp.allclose(out3, ref2, atol=5e-2, rtol=5e-2), "prepadded mismatch"

    print("KERNEL_OK")
</pallas_src>

<mosaic_0001>
module attributes {stable_mosaic.version = 11 : i64} {
  func.func @_linear_softplus_kernel(%arg0: i32, %arg1: i32, %arg2: i32, %arg3: memref<8x128xf32, #tpu.memory_space<vmem>>, %arg4: memref<128x128xf32, #tpu.memory_space<vmem>>, %arg5: memref<1x128xf32, #tpu.memory_space<vmem>>, %arg6: memref<8x128xf32, #tpu.memory_space<vmem>>) attributes {dimension_semantics = [#tpu.dimension_semantics<parallel>, #tpu.dimension_semantics<parallel>, #tpu.dimension_semantics<arbitrary>], iteration_bounds = array<i64: 1, 1, 1>, scalar_prefetch = 0 : i64, scratch_operands = 0 : i64, tpu.core_type = #tpu.core_type<tc>, window_params = [{transform_indices = @transform_0, window_bounds = array<i64: 8, 128>}, {transform_indices = @transform_1, window_bounds = array<i64: 128, 128>}, {transform_indices = @transform_2, window_bounds = array<i64: 1, 128>}, {transform_indices = @transform_3, window_bounds = array<i64: 8, 128>}]} {
    %c0_i32 = arith.constant 0 : i32
    %0 = arith.cmpi eq, %arg2, %c0_i32 : i32
    %1 = arith.extui %0 : i1 to i32
    %c0_i32_0 = arith.constant 0 : i32
    %2 = arith.cmpi ne, %1, %c0_i32_0 : i32
    scf.if %2 {
      %cst_10 = arith.constant 0.000000e+00 : f32
      %12 = vector.broadcast %cst_10 : f32 to vector<8x128xf32>
      %c0_11 = arith.constant 0 : index
      %c0_12 = arith.constant 0 : index
      %13 = vector.load %arg6[%c0_11, %c0_12] : memref<8x128xf32, #tpu.memory_space<vmem>>, vector<8x128xf32>
      tpu.vector_store %arg6[%c0_11, %c0_12], %12 {strides = array<i32>} : memref<8x128xf32, #tpu.memory_space<vmem>>, vector<8x128xf32>,
    } else {
    }
    %c0 = arith.constant 0 : index
    %c0_1 = arith.constant 0 : index
    %3 = vector.load %arg6[%c0, %c0_1] : memref<8x128xf32, #tpu.memory_space<vmem>>, vector<8x128xf32>
    %c0_2 = arith.constant 0 : index
    %c0_3 = arith.constant 0 : index
    %4 = vector.load %arg3[%c0_2, %c0_3] : memref<8x128xf32, #tpu.memory_space<vmem>>, vector<8x128xf32>
    %c0_4 = arith.constant 0 : index
    %c0_5 = arith.constant 0 : index
    %5 = vector.load %arg4[%c0_4, %c0_5] : memref<128x128xf32, #tpu.memory_space<vmem>>, vector<128x128xf32>
    %cst = arith.constant dense<0.000000e+00> : vector<8x128xf32>
    %6 = tpu.matmul %4, %5, %cst {dimension_numbers = #tpu.dot_dimension_numbers<[1], [0], [0], [1], [0, 0, 1, 1], [], []>} : vector<8x128xf32>, vector<128x128xf32>, vector<8x128xf32> -> vector<8x128xf32>
    %7 = arith.addf %3, %6 : vector<8x128xf32>
    %c0_6 = arith.constant 0 : index
    %c0_7 = arith.constant 0 : index
    %8 = vector.load %arg6[%c0_6, %c0_7] : memref<8x128xf32, #tpu.memory_space<vmem>>, vector<8x128xf32>
    tpu.vector_store %arg6[%c0_6, %c0_7], %7 {strides = array<i32>} : memref<8x128xf32, #tpu.memory_space<vmem>>, vector<8x128xf32>,
    %c0_i32_8 = arith.constant 0 : i32
    %9 = arith.cmpi eq, %arg2, %c0_i32_8 : i32
    %10 = arith.extui %9 : i1 to i32
    %c0_i32_9 = arith.constant 0 : i32
    %11 = arith.cmpi ne, %10, %c0_i32_9 : i32
    scf.if %11 {
      %c0_10 = arith.constant 0 : index
      %c0_11 = arith.constant 0 : index
      %12 = vector.load %arg6[%c0_10, %c0_11] : memref<8x128xf32, #tpu.memory_space<vmem>>, vector<8x128xf32>
      %c0_12 = arith.constant 0 : index
      %c0_13 = arith.constant 0 : index
      %13 = vector.load %arg5[%c0_12, %c0_13] : memref<1x128xf32, #tpu.memory_space<vmem>>, vector<1x128xf32>
      %14 = vector.broadcast %13 : vector<1x128xf32> to vector<8x128xf32>
      %15 = arith.addf %12, %14 : vector<8x128xf32>
      %cst_14 = arith.constant 2.000000e+01 : f32
      %16 = vector.broadcast %cst_14 : f32 to vector<8x128xf32>
      %17 = arith.minimumf %15, %16 : vector<8x128xf32>
      %18 = math.exp %17 : vector<8x128xf32>
      %19 = math.log1p %18 : vector<8x128xf32>
      %cst_15 = arith.constant 2.000000e+01 : f32
      %20 = vector.broadcast %cst_15 : f32 to vector<8x128xf32>
      %21 = arith.cmpf ogt, %15, %20 : vector<8x128xf32>
      %22 = arith.select %21, %15, %19 : vector<8x128xi1>, vector<8x128xf32>
      %c0_16 = arith.constant 0 : index
      %c0_17 = arith.constant 0 : index
      %23 = vector.load %arg6[%c0_16, %c0_17] : memref<8x128xf32, #tpu.memory_space<vmem>>, vector<8x128xf32>
      tpu.vector_store %arg6[%c0_16, %c0_17], %22 {strides = array<i32>} : memref<8x128xf32, #tpu.memory_space<vmem>>, vector<8x128xf32>,
    } else {
    }
    return
  }
  func.func @transform_0(%arg0: i32, %arg1: i32, %arg2: i32) -> (i32, i32) {
    %c0_i32 = arith.constant 0 : i32
    return %arg0, %arg2 : i32, i32
  }
  func.func @transform_1(%arg0: i32, %arg1: i32, %arg2: i32) -> (i32, i32) {
    %c0_i32 = arith.constant 0 : i32
    return %arg2, %arg1 : i32, i32
  }
  func.func @transform_2(%arg0: i32, %arg1: i32, %arg2: i32) -> (i32, i32) {
    %c0_i32 = arith.constant 0 : i32
    %c0_i32_0 = arith.constant 0 : i32
    return %c0_i32, %arg1 : i32, i32
  }
  func.func @transform_3(%arg0: i32, %arg1: i32, %arg2: i32) -> (i32, i32) {
    %c0_i32 = arith.constant 0 : i32
    return %arg0, %arg1 : i32, i32
  }
}

</mosaic_0001>

<bundles_post_ra>
// kernel: my_model_forward.1
= control target key start
LH: loop header
LB: loop body
LE: loop exit
PB: predicated region body
PF: predicated region fallthrough
CT: control target
= control target key end

     0   :  { %v260_v3 = vmov 0.0|0.0   ;;  %vm261_vm0 = vmmov 0   ;;  %v262_v6 = vmov 0.0   ;;  %s350_s0 = inlined_call_operand.vmem [shape: f32[8,128], index: 0, kind: input, shape index: {}]   ;;  %s351_s1 = inlined_call_operand.vmem [shape: f32[128,128], index: 1, kind: input, shape index: {}]   ;;  %s352_s2 = inlined_call_operand.vmem [shape: f32[1,128], index: 2, kind: input, shape index: {}]   ;;  %s353_s3 = inlined_call_operand.hbm [shape: f32[8,128], index: 3, kind: output, shape index: {}]  }
   0x1   :  { %v22_v0 = vld [vmem:[%s351_s1] sm:$0xff]  ;;  %v23_v1 = vld [vmem:[%s351_s1 + $0x8] sm:$0xff]  ;;  %v24_v2 = vld [vmem:[%s351_s1 + $0x10] sm:$0xff]  ;;  %204 = vmatprep.subr.bf16.mxu0 %v260_v3  ;;  %201 = vmatprep.mubr.msk.f32.mxu0 %vm261_vm0, %v262_v6 }
   0x2   :  { %v205_v4 = vpack.c.bf16 %v23_v1, %v22_v0  ;;  %v25_v5 = vld [vmem:[%s351_s1 + $0x18] sm:$0xff]  ;;  %v26_v8 = vld [vmem:[%s351_s1 + $0x20] sm:$0xff]  ;;  %v27_v9 = vld [vmem:[%s351_s1 + $0x28] sm:$0xff] }
   0x3   :  { %v208_v7 = vpack.c.bf16 %v25_v5, %v24_v2 }
   0x4   :  { %206 = vmatpush3.bf16.msra.mxu0 %v205_v4 }
   0x5   :  { %207 = vmatprep.subr.bf16.mxu0 %v260_v3 }
   0x6   :  { %8 = vsyncpa [#allocation3], 0  ;;  %v211_v10 = vpack.c.bf16 %v27_v9, %v26_v8  ;;  %v28_v11 = vld [vmem:[%s351_s1 + $0x30] sm:$0xff]  ;;  %v29_v12 = vld [vmem:[%s351_s1 + $0x38] sm:$0xff] }
   0x7   :  { %v214_v13 = vpack.c.bf16 %v29_v12, %v28_v11  ;;  %v30_v14 = vld [vmem:[%s351_s1 + $0x40] sm:$0xff]  ;;  %v31_v15 = vld [vmem:[%s351_s1 + $0x48] sm:$0xff]  ;;  %v32_v17 = vld [vmem:[%s351_s1 + $0x50] sm:$0xff] }
   0x8   :  { %209 = vmatpush3.bf16.msra.mxu0 %v208_v7  ;;  %v217_v16 = vpack.c.bf16 %v31_v15, %v30_v14  ;;  %v33_v18 = vld [vmem:[%s351_s1 + $0x58] sm:$0xff]  ;;  %v34_v20 = vld [vmem:[%s351_s1 + $0x60] sm:$0xff]  ;;  %v35_v21 = vld [vmem:[%s351_s1 + $0x68] sm:$0xff] }
   0x9   :  { %210 = vmatprep.subr.bf16.mxu0 %v260_v3  ;;  %v220_v19 = vpack.c.bf16 %v33_v18, %v32_v17  ;;  %v223_v22 = vpack.c.bf16 %v35_v21, %v34_v20  ;;  %v36_v23 = vld [vmem:[%s351_s1 + $0x70] sm:$0xff]  ;;  %v37_v24 = vld [vmem:[%s351_s1 + $0x78] sm:$0xff]  ;;  %v21_v26 = vld [vmem:[%s350_s0] sm:$0xff]  ;;  %s263_s1 = smov [#allocation2]  }
   0xa   :  { %v226_v25 = vpack.c.bf16 %v37_v24, %v36_v23  ;;  %v151_v28 = vld [vmem:[%s352_s2] ss:$0 sm:$0xff]  ;;  %s143_s0 = sshll.u32 %s263_s1, 4  ;;  %s144_s0 = int_to_ptr.vmem [resolvable:$true] %s143_s0 }
   0xb   :  { %s236_s2 = scalar_lea.vmem %s144_s0, 128  ;;  %p241_p1 = scmp.lt.s32.totalorder %s144_s0, %s144_s0 }
   0xc   :  { %212 = vmatpush3.bf16.msra.mxu0 %v211_v10  ;;  %p237_p0 = scmp.ne.s32.totalorder %s144_s0, %s236_s2  ;;  %p242_p2 = scmp.lt.s32.totalorder %s236_s2, %s236_s2 }
   0xd   :  { %213 = vmatprep.subr.bf16.mxu0 %v260_v3 }
   0xe   :  { %p243_p3 = por %p242_p2, %p241_p1 }
  0x10   :  { %215 = vmatpush3.bf16.msra.mxu0 %v214_v13  ;;  %p244_p4 = pnand %p243_p3, %p237_p0 }
  0x11   :  { %216 = vmatprep.subr.bf16.mxu0 %v260_v3 }
  0x14   :  { %218 = vmatpush3.bf16.msra.mxu0 %v217_v16 }
  0x15   :  { %219 = vmatprep.subr.bf16.mxu0 %v260_v3 }
  0x18   :  { %221 = vmatpush3.bf16.msra.mxu0 %v220_v19 }
  0x19   :  { %222 = vmatprep.subr.bf16.mxu0 %v260_v3 }
  0x1c   :  { %224 = vmatpush3.bf16.msra.mxu0 %v223_v22 }
  0x1d   :  { %225 = vmatprep.subr.bf16.mxu0 %v260_v3 }
  0x20   :  { %227 = vmatpush3.bf16.msra.mxu0 %v226_v25 }
  0x23   :  { %202 = vmatmul.mubr.f32.vlgmr.msra.gmra.mrb[0].mxu0 %v21_v26 }
  0xf6   :  { %v104_v27 = vpop.f32.mrb[0].mxu0 }
  0xf7   :  { %v203_v29 = vpop.f32.mrb[1].mxu0  ;;  %v121_v30 = vadd.f32 %v151_v28, %v104_v27 }
  0xf9   :  { %v122_v31 = vmin.f32 %v121_v30, 20.0  ;;  %vm134_vm2 = vcmp.gt.f32.partialorder %v121_v30, 20.0 }
  0xfb   :  { %v123_v32 = vmul.f32 1.442695, %v122_v31 }
  0xfd   :  { %232 = vpow2.f32 %v123_v32 }
 0x107   :  { %v233_v33 = vpop.eup %232 }
 0x108   :  { %v125_v34 = vadd.f32 1.0, %v233_v33  ;;  %v128_v35 = vmul.f32 -0.5, %v233_v33  ;;  %v131_v37 = vand.u32 2147483647, %v233_v33 }
 0x10a   :  { %234 = vlog2.f32 %v125_v34  ;;  %v129_v36 = vadd.f32 1.0, %v128_v35  ;;  %vm132_vm1 = vcmp.lt.f32.partialorder %v131_v37, 0.0004427343 }
 0x10c   :  { %v130_v40 = vmul.f32 %v233_v33, %v129_v36 }
 0x114   :  { %v235_v38 = vpop.eup %234 }
 0x115   :  { %v127_v39 = vmul.f32 0.6931472, %v235_v38 }
 0x117   :  { %v133_v41 = vsel %vm132_vm1, %v130_v40, %v127_v39 }
 0x118   :  { %v135_v42 = vsel %vm134_vm2, %v121_v30, %v133_v41 }
 0x119   :  { %136 = vst [vmem:[#allocation2] sm:$0xff] %v135_v42 }
 0x11a   :  { %247 = shalt.err (!%p244_p4)
}
 0x11b   :  { %s248_s23 = scalar_lea.hbm %s353_s3, 128 }
 0x11c   :  { %p249_p5 = scmp.ne.s32.totalorder %s353_s3, %s248_s23  ;;  %p252_p6 = scmp.lt.u32.totalorder %s248_s23, %s353_s3 }
 0x11e   :  { %p254_p7 = pnand %p252_p6, %p249_p5 }
 0x120   :  { %257 = shalt.err (!%p254_p7)
}
 0x121   :  { %146 = dma.vmem_to_hbm [thread:$0]  %s144_s0, 128, %s353_s3, [#allocation3]  }
 0x122   :  { %258 = dma.done.wait [#allocation3], 128  }
 0x123   :  { %259 = vsyncadd [#allocation3], 4294967168 }
 0x124   :  { %150 = vsyncpa [#allocation3], 1 }

</bundles_post_ra>
